<compile_context>
chip_gen: v7x
topology: tpu7x:2x2x1
jax: 0.10.0
libtpu: 0.0.40
codegen_flags: <defaults>
</compile_context>

<pallas_src>
import math
from functools import partial

import jax
import jax.numpy as jnp
from jax.experimental import pallas as pl
from jax.experimental.pallas import tpu as pltpu  # noqa: F401  (kept for TPU-specific tuning hooks)

ACTION_DIM = 4


def _uniform_pm1_kernel(bits_ref, out_ref):
    """Map raw uint32 random words to uniform float32 values in [-1, 1)."""
    # Top 23 random bits -> exact int32 -> float32, then one fused affine map.
    top = (bits_ref[...] >> jnp.uint32(9)).astype(jnp.int32)          # in [0, 2^23)
    out_ref[...] = top.astype(jnp.float32) * jnp.float32(2.0 ** -22) - jnp.float32(1.0)


@partial(jax.jit, static_argnums=(1, 2))
def _sample_uniform_actions(key, batch: int, action_dim: int):
    """One fused dispatch: split key, draw random bits, map to [-1, 1) actions."""
    new_key, sub = jax.random.split(key)
    bits = jax.random.bits(sub, (batch, action_dim), dtype=jnp.uint32)
    flat = pl.pallas_call(
        _uniform_pm1_kernel,
        out_shape=jax.ShapeDtypeStruct((batch, action_dim), jnp.float32),
        in_specs=[pl.BlockSpec((batch, action_dim), lambda: (0, 0))],
        out_specs=pl.BlockSpec((batch, action_dim), lambda: (0, 0)),
    )(bits)
    return flat, new_key


def debug_policy_forward(tensordict, actions=None, i=0, key=None):
    """JAX/Pallas equivalent of debug_policy.forward.

    `tensordict` is a plain dict keyed by tuples (mirrors TensorDict keys).
    Returns (updated tensordict, next index i, next PRNG key).
    """
    td = dict(tensordict)
    if actions is not None:
        # PyTorch: action = actions[i].expand(1, 1, 4)  — pure broadcast, left as glue.
        action = jnp.broadcast_to(jnp.asarray(actions[i]), (1, 1, ACTION_DIM))
        i = (i + 1) % actions.shape[0]
        td[("agents", "action")] = action
        return td, i, key

    observation = td[("agents", "observation")]
    lead = tuple(int(d) for d in observation.shape[:-2])   # observation.shape[:-2]
    batch = math.prod(lead) if lead else 1
    flat, key = _sample_uniform_actions(key, batch, ACTION_DIM)
    td[("agents", "action")] = flat.reshape(lead + (1, ACTION_DIM))
    return td, i, key


if __name__ == "__main__":
    root = jax.random.PRNGKey(0)
    obs_key, policy_key = jax.random.split(root)

    # Small observation consistent with the module: (batch, n_agents, obs_dim).
    obs = jax.random.normal(obs_key, (2, 1, 32), dtype=jnp.float32)
    td = {("agents", "observation"): obs}

    # Random-action branch (actions=None) — the hot path through the Pallas kernel.
    out_td, i, policy_key = debug_policy_forward(td, actions=None, i=0, key=policy_key)
    a1 = jax.block_until_ready(out_td[("agents", "action")])
    assert a1.shape == (2, 1, ACTION_DIM), a1.shape
    assert a1.dtype == jnp.float32
    assert bool(jnp.all(a1 >= -1.0)) and bool(jnp.all(a1 < 1.0))

    # Second call: key is threaded forward -> fresh randomness (stateful like torch.rand).
    out_td2, i, policy_key = debug_policy_forward(td, actions=None, i=i, key=policy_key)
    a2 = jax.block_until_ready(out_td2[("agents", "action")])
    assert a2.shape == a1.shape
    assert bool(jnp.any(a1 != a2))

    # Scripted-action branch (pure broadcast glue, no kernel needed).
    scripted = jnp.arange(3 * ACTION_DIM, dtype=jnp.float32).reshape(3, ACTION_DIM)
    out_td3, nxt, _ = debug_policy_forward(td, actions=scripted, i=0, key=policy_key)
    a3 = jax.block_until_ready(out_td3[("agents", "action")])
    assert a3.shape == (1, 1, ACTION_DIM) and nxt == 1
    assert bool(jnp.all(a3 == scripted[0]))

    print("KERNEL_OK")
</pallas_src>

<mosaic_0001>
module attributes {stable_mosaic.version = 11 : i64} {
  func.func @_uniform_pm1_kernel(%arg0: memref<2x4xi32, #tpu.memory_space<vmem>>, %arg1: memref<2x4xf32, #tpu.memory_space<vmem>>) attributes {dimension_semantics = [], scalar_prefetch = 0 : i64, scratch_operands = 0 : i64, tpu.core_type = #tpu.core_type<tc>} {
    %c0 = arith.constant 0 : index
    %c0_0 = arith.constant 0 : index
    %0 = vector.load %arg0[%c0, %c0_0] : memref<2x4xi32, #tpu.memory_space<vmem>>, vector<2x4xi32>
    %c9_i32 = arith.constant 9 : i32
    %1 = vector.broadcast %c9_i32 : i32 to vector<2x4xi32>
    %2 = arith.shrui %0, %1 : vector<2x4xi32>
    %3 = arith.sitofp %2 : vector<2x4xi32> to vector<2x4xf32>
    %cst = arith.constant 2.38418579E-7 : f32
    %4 = vector.broadcast %cst : f32 to vector<2x4xf32>
    %5 = arith.mulf %3, %4 : vector<2x4xf32>
    %cst_1 = arith.constant 1.000000e+00 : f32
    %6 = vector.broadcast %cst_1 : f32 to vector<2x4xf32>
    %7 = arith.subf %5, %6 : vector<2x4xf32>
    %c0_2 = arith.constant 0 : index
    %c0_3 = arith.constant 0 : index
    %8 = vector.load %arg1[%c0_2, %c0_3] : memref<2x4xf32, #tpu.memory_space<vmem>>, vector<2x4xf32>
    tpu.vector_store %arg1[%c0_2, %c0_3], %7 {strides = array<i32>} : memref<2x4xf32, #tpu.memory_space<vmem>>, vector<2x4xf32>,
    return
  }
}

</mosaic_0001>

<bundles_post_ra>
// kernel: _sample_uniform_actions.3
= control target key start
LH: loop header
LB: loop body
LE: loop exit
PB: predicated region body
PF: predicated region fallthrough
CT: control target
= control target key end

     0   :  { %s82_s0 = inlined_call_operand.vmem [shape: u32[2,4], index: 0, kind: input, shape index: {}]   ;;  %s83_s1 = inlined_call_operand.hbm [shape: f32[2,4], index: 1, kind: output, shape index: {}]  }
   0x1   :  { %v9_v0 = vld [vmem:[%s82_s0] sm:$0x3] }
   0x2   :  { %6 = vsyncpa [#allocation3], 0  ;;  %v10_v1 = vshrl.u32 %v9_v0, 9  ;;  %s56_s8 = smov [#allocation2]   ;;  %vm14_vm0 = vcmask 25600  }
   0x3   :  { %s22_s9 = sshll.u32 %s56_s8, 4  ;;  %s23_s9 = int_to_ptr.vmem [resolvable:$true] %s22_s9 }
   0x4   :  { %v11_v2 = vcvt.s32.f32 %v10_v1  ;;  %s32_s10 = scalar_lea.vmem %s23_s9, 32  ;;  %p37_p1 = scmp.lt.s32.totalorder %s23_s9, %s23_s9 }
   0x5   :  { %p33_p0 = scmp.ne.s32.totalorder %s23_s9, %s32_s10  ;;  %p38_p2 = scmp.lt.s32.totalorder %s32_s10, %s32_s10 }
   0x6   :  { %v12_v3 = vmul.f32 2.3841858e-07, %v11_v2 }
   0x7   :  { %p39_p3 = por %p38_p2, %p37_p1 }
   0x8   :  { %v30_v4 = vadd.f32 -1.0, %v12_v3 }
   0x9   :  { %p40_p4 = pnand %p39_p3, %p33_p0 }
   0xa   :  { %15 = vst.msk [vmem:[#allocation2] sm:$0x3] %vm14_vm0, %v30_v4 }
   0xb   :  { %43 = shalt.err (!%p40_p4)
}
   0xc   :  { %s44_s0 = scalar_lea.hbm %s83_s1, 32 }
   0xd   :  { %p45_p5 = scmp.ne.s32.totalorder %s83_s1, %s44_s0  ;;  %p48_p6 = scmp.lt.u32.totalorder %s44_s0, %s83_s1 }
   0xf   :  { %p50_p7 = pnand %p48_p6, %p45_p5 }
  0x11   :  { %53 = shalt.err (!%p50_p7)
}
  0x12   :  { %25 = dma.vmem_to_hbm [thread:$0]  %s23_s9, 32, %s83_s1, [#allocation3]  }
  0x13   :  { %54 = dma.done.wait [#allocation3], 32  }
  0x14   :  { %55 = vsyncadd [#allocation3], 4294967264 }
  0x15   :  { %29 = vsyncpa [#allocation3], 1 }

</bundles_post_ra>
